<compile_context>
chip_gen: v5e
topology: v5e:2x2
jax: 0.10.0
libtpu: 0.0.40
codegen_flags: <defaults>
</compile_context>

<pallas_src>
import functools

import jax
import jax.numpy as jnp
from jax.experimental import pallas as pl
from jax.experimental.pallas import tpu as pltpu


def _round_up(n, m):
    return ((n + m - 1) // m) * m


def _make_corr_kernel(kh, kw, hp, wp):
    """Kernel body specialized for static kernel size and padded tile size."""

    def corr_kernel(w_ref, b_ref, x_ref, o_ref):
        x = x_ref[...]  # one full (hp, wp) VMEM tile, lane-dense

        # Build one independent term per tap. Shifts are done with XLU rolls
        # (rotation by hp-i / wp-j == rotation by -i / -j); the wrap-around rows /
        # cols land outside the valid (oh, ow) window, which is sliced in the wrapper.
        terms = []
        for i in range(kh):
            for j in range(kw):
                xs = x
                if i:
                    xs = pltpu.roll(xs, shift=hp - i, axis=0)
                if j:
                    xs = pltpu.roll(xs, shift=wp - j, axis=1)
                terms.append(w_ref[i * kw + j] * xs)

        # Fold the bias into the first term (no separate zeros-init / bias pass).
        terms[0] = terms[0] + b_ref[0]

        # Tree-reduce the partial terms so VALU adds are independent, not a
        # single serial dependency chain.
        while len(terms) > 1:
            nxt = []
            for a in range(0, len(terms) - 1, 2):
                nxt.append(terms[a] + terms[a + 1])
            if len(terms) % 2:
                nxt.append(terms[-1])
            terms = nxt

        o_ref[...] = terms[0]

    return corr_kernel


@functools.partial(jax.jit, static_argnames=())
def conv_forward(x, weight, bias):
    """Equivalent of Conv.forward: corr(x, weight) + bias."""
    H, W = x.shape
    kh, kw = weight.shape
    oh, ow = H - kh + 1, W - kw + 1

    # Pad the input so the VMEM tile is (8, 128)-aligned: sublane-aligned rows,
    # lane-dense (multiple of 128) columns -> unmasked vector loads/stores.
    hp = _round_up(max(H, 8), 8)
    wp = _round_up(max(W, 128), 128)
    x_pad = jnp.zeros((hp, wp), jnp.float32).at[:H, :W].set(x.astype(jnp.float32))

    w_flat = weight.astype(jnp.float32).reshape(kh * kw)  # 1-D SMEM (tiny padding)
    b = bias.astype(jnp.float32).reshape(1)

    kernel = _make_corr_kernel(kh, kw, hp, wp)

    out_full = pl.pallas_call(
        kernel,
        out_shape=jax.ShapeDtypeStruct((hp, wp), jnp.float32),
        # No grid: the whole (small, padded) problem fits in one VMEM tile.
        in_specs=[
            pl.BlockSpec(memory_space=pltpu.SMEM),   # weight (flattened): scalar reads
            pl.BlockSpec(memory_space=pltpu.SMEM),   # bias: scalar
            pl.BlockSpec(memory_space=pltpu.VMEM),   # x_pad: full lane-dense tile
        ],
        out_specs=pl.BlockSpec(memory_space=pltpu.VMEM),
    )(w_flat, b, x_pad)

    # Take the valid window outside the kernel (keeps the in-kernel store lane-dense).
    return out_full[:oh, :ow]


def corr_ref(x, k):
    """Pure-JAX reference matching the PyTorch `corr` loop."""
    kh, kw = k.shape
    oh, ow = x.shape[0] - kh + 1, x.shape[1] - kw + 1
    out = jnp.zeros((oh, ow), jnp.float32)
    for i in range(kh):
        for j in range(kw):
            out = out + k[i, j] * x[i:i + oh, j:j + ow]
    return out


if __name__ == "__main__":
    key = jax.random.PRNGKey(0)
    k_x, k_w = jax.random.split(key)

    # Small shapes consistent with the module: a 16x16 input, 3x3 kernel.
    H, W = 16, 16
    kernel_size = (3, 3)

    x = jax.random.normal(k_x, (H, W), dtype=jnp.float32)
    # nn.Parameter(torch.rand(kernel_size)) -> uniform [0, 1); deterministic init here.
    weight = jax.random.uniform(k_w, kernel_size, dtype=jnp.float32)
    # nn.Parameter(torch.zeros(1))
    bias = jnp.zeros((1,), dtype=jnp.float32)

    out = conv_forward(x, weight, bias)
    out = jax.block_until_ready(out)

    expected = corr_ref(x, weight) + bias[0]
    assert out.shape == (H - kernel_size[0] + 1, W - kernel_size[1] + 1)
    assert jnp.allclose(out, expected, atol=1e-5, rtol=1e-5)

    print("KERNEL_OK")
</pallas_src>

<mosaic_0001>
module attributes {stable_mosaic.version = 11 : i64} {
  func.func @corr_kernel(%arg0: memref<9xf32, #tpu.memory_space<smem>>, %arg1: memref<1xf32, #tpu.memory_space<smem>>, %arg2: memref<16x128xf32, #tpu.memory_space<vmem>>, %arg3: memref<16x128xf32, #tpu.memory_space<vmem>>) attributes {dimension_semantics = [], scalar_prefetch = 0 : i64, scratch_operands = 0 : i64, tpu.core_type = #tpu.core_type<tc>} {
    %c0 = arith.constant 0 : index
    %c0_0 = arith.constant 0 : index
    %0 = vector.load %arg2[%c0, %c0_0] : memref<16x128xf32, #tpu.memory_space<vmem>>, vector<16x128xf32>
    %c0_1 = arith.constant 0 : index
    %1 = memref.load %arg0[%c0_1] : memref<9xf32, #tpu.memory_space<smem>>
    %2 = vector.broadcast %1 : f32 to vector<16x128xf32>
    %3 = arith.mulf %2, %0 : vector<16x128xf32>
    %c127_i32 = arith.constant 127 : i32
    %4 = tpu.dynamic_rotate %0 by %c127_i32 dim 1 : vector<16x128xf32>, i32 -> vector<16x128xf32>
    %c1 = arith.constant 1 : index
    %5 = memref.load %arg0[%c1] : memref<9xf32, #tpu.memory_space<smem>>
    %6 = vector.broadcast %5 : f32 to vector<16x128xf32>
    %7 = arith.mulf %6, %4 : vector<16x128xf32>
    %c126_i32 = arith.constant 126 : i32
    %8 = tpu.dynamic_rotate %0 by %c126_i32 dim 1 : vector<16x128xf32>, i32 -> vector<16x128xf32>
    %c2 = arith.constant 2 : index
    %9 = memref.load %arg0[%c2] : memref<9xf32, #tpu.memory_space<smem>>
    %10 = vector.broadcast %9 : f32 to vector<16x128xf32>
    %11 = arith.mulf %10, %8 : vector<16x128xf32>
    %c15_i32 = arith.constant 15 : i32
    %12 = tpu.dynamic_rotate %0 by %c15_i32 dim 0 : vector<16x128xf32>, i32 -> vector<16x128xf32>
    %c3 = arith.constant 3 : index
    %13 = memref.load %arg0[%c3] : memref<9xf32, #tpu.memory_space<smem>>
    %14 = vector.broadcast %13 : f32 to vector<16x128xf32>
    %15 = arith.mulf %14, %12 : vector<16x128xf32>
    %c15_i32_2 = arith.constant 15 : i32
    %16 = tpu.dynamic_rotate %0 by %c15_i32_2 dim 0 : vector<16x128xf32>, i32 -> vector<16x128xf32>
    %c127_i32_3 = arith.constant 127 : i32
    %17 = tpu.dynamic_rotate %16 by %c127_i32_3 dim 1 : vector<16x128xf32>, i32 -> vector<16x128xf32>
    %c4 = arith.constant 4 : index
    %18 = memref.load %arg0[%c4] : memref<9xf32, #tpu.memory_space<smem>>
    %19 = vector.broadcast %18 : f32 to vector<16x128xf32>
    %20 = arith.mulf %19, %17 : vector<16x128xf32>
    %c15_i32_4 = arith.constant 15 : i32
    %21 = tpu.dynamic_rotate %0 by %c15_i32_4 dim 0 : vector<16x128xf32>, i32 -> vector<16x128xf32>
    %c126_i32_5 = arith.constant 126 : i32
    %22 = tpu.dynamic_rotate %21 by %c126_i32_5 dim 1 : vector<16x128xf32>, i32 -> vector<16x128xf32>
    %c5 = arith.constant 5 : index
    %23 = memref.load %arg0[%c5] : memref<9xf32, #tpu.memory_space<smem>>
    %24 = vector.broadcast %23 : f32 to vector<16x128xf32>
    %25 = arith.mulf %24, %22 : vector<16x128xf32>
    %c14_i32 = arith.constant 14 : i32
    %26 = tpu.dynamic_rotate %0 by %c14_i32 dim 0 : vector<16x128xf32>, i32 -> vector<16x128xf32>
    %c6 = arith.constant 6 : index
    %27 = memref.load %arg0[%c6] : memref<9xf32, #tpu.memory_space<smem>>
    %28 = vector.broadcast %27 : f32 to vector<16x128xf32>
    %29 = arith.mulf %28, %26 : vector<16x128xf32>
    %c14_i32_6 = arith.constant 14 : i32
    %30 = tpu.dynamic_rotate %0 by %c14_i32_6 dim 0 : vector<16x128xf32>, i32 -> vector<16x128xf32>
    %c127_i32_7 = arith.constant 127 : i32
    %31 = tpu.dynamic_rotate %30 by %c127_i32_7 dim 1 : vector<16x128xf32>, i32 -> vector<16x128xf32>
    %c7 = arith.constant 7 : index
    %32 = memref.load %arg0[%c7] : memref<9xf32, #tpu.memory_space<smem>>
    %33 = vector.broadcast %32 : f32 to vector<16x128xf32>
    %34 = arith.mulf %33, %31 : vector<16x128xf32>
    %c14_i32_8 = arith.constant 14 : i32
    %35 = tpu.dynamic_rotate %0 by %c14_i32_8 dim 0 : vector<16x128xf32>, i32 -> vector<16x128xf32>
    %c126_i32_9 = arith.constant 126 : i32
    %36 = tpu.dynamic_rotate %35 by %c126_i32_9 dim 1 : vector<16x128xf32>, i32 -> vector<16x128xf32>
    %c8 = arith.constant 8 : index
    %37 = memref.load %arg0[%c8] : memref<9xf32, #tpu.memory_space<smem>>
    %38 = vector.broadcast %37 : f32 to vector<16x128xf32>
    %39 = arith.mulf %38, %36 : vector<16x128xf32>
    %c0_10 = arith.constant 0 : index
    %40 = memref.load %arg1[%c0_10] : memref<1xf32, #tpu.memory_space<smem>>
    %41 = vector.broadcast %40 : f32 to vector<16x128xf32>
    %42 = arith.addf %3, %41 : vector<16x128xf32>
    %43 = arith.addf %42, %7 : vector<16x128xf32>
    %44 = arith.addf %11, %15 : vector<16x128xf32>
    %45 = arith.addf %20, %25 : vector<16x128xf32>
    %46 = arith.addf %29, %34 : vector<16x128xf32>
    %47 = arith.addf %43, %44 : vector<16x128xf32>
    %48 = arith.addf %45, %46 : vector<16x128xf32>
    %49 = arith.addf %47, %48 : vector<16x128xf32>
    %50 = arith.addf %49, %39 : vector<16x128xf32>
    %c0_11 = arith.constant 0 : index
    %c0_12 = arith.constant 0 : index
    %51 = vector.load %arg3[%c0_11, %c0_12] : memref<16x128xf32, #tpu.memory_space<vmem>>, vector<16x128xf32>
    tpu.vector_store %arg3[%c0_11, %c0_12], %50 {strides = array<i32>} : memref<16x128xf32, #tpu.memory_space<vmem>>, vector<16x128xf32>,
    return
  }
}

</mosaic_0001>

<bundles_post_ra>
// kernel: conv_forward.1
= control target key start
LH: loop header
LB: loop body
LE: loop exit
PB: predicated region body
PF: predicated region fallthrough
CT: control target
= control target key end

     0   :  { %9 = vsyncpa [#allocation5], 0  ;;  %s266_s0 = inlined_call_operand.vmem [shape: f32[9], index: 0, kind: input, shape index: {}]   ;;  %s267_s1 = inlined_call_operand.<no memory space> [shape: f32[1], index: 1, kind: input, shape index: {}]   ;;  %s268_s2 = inlined_call_operand.vmem [shape: f32[16,128], index: 2, kind: input, shape index: {}]   ;;  %s269_s3 = inlined_call_operand.hbm [shape: f32[16,128], index: 3, kind: output, shape index: {}]  }
   0x1   :  { %10 = vsyncpa [#allocation4], 0  ;;  %s16_s14 = sshll.u32 %s266_s0, 4  ;;  %s198_s15 = smov [#allocation3]   ;;  %s17_s14 = int_to_ptr.vmem [resolvable:$true] %s16_s14 }
   0x2   :  { %19 = dma.vmem_to_smem %s17_s14, 16, %s198_s15, [#allocation5]  }
   0x3   :  { %194 = dma.done.wait [#allocation5], 16  }
   0x4   :  { %195 = vsyncadd [#allocation5], 4294967280 }
   0x5   :  { %28 = sfence }
   0x6   :  { %v29_v0 = vld [vmem:[%s268_s2] sm:$0xff]  ;;  %v30_v1 = vld [vmem:[%s268_s2 + $0x8] sm:$0xff]  ;;  %v53_v2 = vlaneseq  ;;  %s199_s20 = smov 126   ;;  %s200_s21 = smov 127   ;;  %v104_v22 = vstv %s267_s1 }
   0x7   :  { %43 = vrot.lane.b32.xlu1 %v29_v0, %s199_s20  ;;  %35 = vrot.lane.b32.xlu0 %v29_v0, %s200_s21  ;;  %v51_v3 = vrot.slane %v29_v0, 1  ;;  %v52_v4 = vrot.slane %v30_v1, 1  ;;  %v78_v8 = vrot.slane %v29_v0, 2  ;;  %v79_v9 = vrot.slane %v30_v1, 2  ;;  %s233_s0 = sld [smem:[#allocation3]]  ;;  %s201_s1 = smov [#allocation6]  }
   0x8   :  { %v54_v5 = vshrl.u32 %v53_v2, 7  ;;  %s235_s2 = sld [smem:[#allocation3 + $0x3]]  ;;  %s129_s4 = sshll.u32 %s201_s1, 4  ;;  %s130_s4 = int_to_ptr.vmem [resolvable:$true] %s129_s4 }
   0x9   :  { %s237_s22 = sld [smem:[#allocation3 + $0x6]]  ;;  %s131_s7 = sshll.u32 %s269_s3, 4  ;;  %s132_s7 = int_to_ptr.hbm [resolvable:$true] %s131_s7 }
   0xa   :  { %vm55_vm0 = vcmp.lt.s32.totalorder %v54_v5, 7  ;;  %vm80_vm1 = vcmp.lt.s32.totalorder %v54_v5, 6  ;;  %s239_s23 = sld [smem:[#allocation3 + $0x2]]  ;;  %s202_s8 = smov 128  }
   0xb   :  { %v56_v6 = vsel %vm55_vm0, %v51_v3, %v52_v4  ;;  %v57_v7 = vsel %vm55_vm0, %v52_v4, %v51_v3  ;;  %v81_v10 = vsel %vm80_vm1, %v78_v8, %v79_v9  ;;  %v82_v11 = vsel %vm80_vm1, %v79_v9, %v78_v8  ;;  %s241_s24 = sld [smem:[#allocation3 + $0x1]]  ;;  %s203_s9 = smov 8  }
   0xc   :  { %62 = vrot.lane.b32.xlu2 %v56_v6, %s200_s21  ;;  %s243_s25 = sld [smem:[#allocation3 + $0x7]] }
   0xd   :  { %v32_v16 = vstv %s233_s0  ;;  %s246_s26 = sld [smem:[#allocation3 + $0x4]] }
   0xe   :  { %s248_s27 = sld [smem:[#allocation3 + $0x5]]  ;;  %v33_v17 = vmul.f32 %v32_v16, %v29_v0  ;;  %v59_v20 = vstv %s235_s2  ;;  %v34_v36 = vmul.f32 %v32_v16, %v30_v1 }
   0xf   :  { %45 = vrot.lane.b32.xlu1 %v30_v1, %s199_s20  ;;  %37 = vrot.lane.b32.xlu0 %v30_v1, %s200_s21  ;;  %v84_v21 = vstv %s237_s22  ;;  %v60_v27 = vmul.f32 %v59_v20, %v56_v6  ;;  %s260_s30 = sld [smem:[#allocation3 + $0x8]]  ;;  %v61_v44 = vmul.f32 %v59_v20, %v57_v7 }
  0x10   :  { %v48_v23 = vstv %s239_s23  ;;  %v85_v28 = vmul.f32 %v84_v21, %v81_v10  ;;  %v105_v29 = vadd.f32 %v104_v22, %v33_v17  ;;  %v106_v45 = vadd.f32 %v104_v22, %v34_v36 }
  0x11   :  { %v40_v24 = vstv %s241_s24  ;;  %v86_v51 = vmul.f32 %v84_v21, %v82_v11 }
  0x12   :  { %v92_v25 = vstv %s243_s25 }
  0x13   :  { %v67_v32 = vstv %s246_s26 }
  0x14   :  { %64 = vrot.lane.b32.xlu2 %v57_v7, %s200_s21  ;;  %v75_v34 = vstv %s248_s27 }
  0x15   :  { %v100_v50 = vstv %s260_s30 }
  0x17   :  { %72 = vrot.lane.b32.xlu1 %v57_v7, %s199_s20  ;;  %70 = vrot.lane.b32.xlu0 %v56_v6, %s199_s20 }
  0x1c   :  { %87 = vrot.lane.b32.xlu2 %v81_v10, %s200_s21 }
  0x1f   :  { %95 = vrot.lane.b32.xlu1 %v81_v10, %s199_s20  ;;  %89 = vrot.lane.b32.xlu0 %v82_v11, %s200_s21 }
  0x24   :  { %97 = vrot.lane.b32.xlu2 %v82_v11, %s199_s20 }
  0x66   :  { %v63_v12 = vpop.permute.xlu2 %62 }
  0x67   :  { %v68_v35 = vmul.f32 %v67_v32, %v63_v12 }
  0x6e   :  { %v65_v13 = vpop.permute.xlu2 %64 }
  0x6f   :  { %v69_v54 = vmul.f32 %v67_v32, %v65_v13 }
  0x76   :  { %v88_v26 = vpop.permute.xlu2 %87 }
  0x77   :  { %v93_v33 = vmul.f32 %v92_v25, %v88_v26 }
  0x79   :  { %v44_v14 = vpop.permute.xlu1 %43  ;;  %v36_v15 = vpop.permute.xlu0 %35  ;;  %v113_v42 = vadd.f32 %v93_v33, %v85_v28 }
  0x7a   :  { %v49_v30 = vmul.f32 %v48_v23, %v44_v14  ;;  %v41_v31 = vmul.f32 %v40_v24, %v36_v15 }
  0x7c   :  { %v109_v39 = vadd.f32 %v60_v27, %v49_v30  ;;  %v107_v40 = vadd.f32 %v105_v29, %v41_v31 }
  0x7e   :  { %v115_v46 = vadd.f32 %v109_v39, %v107_v40  ;;  %v98_v61 = vpop.permute.xlu2 %97 }
  0x7f   :  { %v102_v3 = vmul.f32 %v100_v50, %v98_v61 }
  0x81   :  { %v46_v18 = vpop.permute.xlu1 %45  ;;  %v38_v19 = vpop.permute.xlu0 %37 }
  0x82   :  { %v50_v47 = vmul.f32 %v48_v23, %v46_v18  ;;  %v42_v48 = vmul.f32 %v40_v24, %v38_v19 }
  0x84   :  { %v110_v57 = vadd.f32 %v61_v44, %v50_v47  ;;  %v108_v58 = vadd.f32 %v106_v45, %v42_v48 }
  0x86   :  { %v116_v1 = vadd.f32 %v110_v57, %v108_v58 }
  0x89   :  { %v73_v37 = vpop.permute.xlu1 %72  ;;  %v71_v38 = vpop.permute.xlu0 %70 }
  0x8a   :  { %v76_v41 = vmul.f32 %v75_v34, %v71_v38  ;;  %v77_v52 = vmul.f32 %v75_v34, %v73_v37 }
  0x8c   :  { %v111_v43 = vadd.f32 %v76_v41, %v68_v35  ;;  %v112_v62 = vadd.f32 %v77_v52, %v69_v54 }
  0x8e   :  { %v117_v49 = vadd.f32 %v113_v42, %v111_v43 }
  0x90   :  { %v119_v53 = vadd.f32 %v117_v49, %v115_v46 }
  0x91   :  { %v96_v55 = vpop.permute.xlu1 %95  ;;  %v90_v56 = vpop.permute.xlu0 %89 }
  0x92   :  { %v101_v59 = vmul.f32 %v100_v50, %v96_v55  ;;  %v94_v60 = vmul.f32 %v92_v25, %v90_v56 }
  0x94   :  { %v121_v63 = vadd.f32 %v119_v53, %v101_v59  ;;  %v114_v0 = vadd.f32 %v94_v60, %v86_v51 }
  0x96   :  { %123 = vst [vmem:[#allocation6] sm:$0xff] %v121_v63  ;;  %v118_v2 = vadd.f32 %v114_v0, %v112_v62 }
  0x98   :  { %v120_v4 = vadd.f32 %v118_v2, %v116_v1 }
  0x9a   :  { %v122_v5 = vadd.f32 %v120_v4, %v102_v3 }
  0x9c   :  { %124 = vst [vmem:[#allocation6 + $0x8] sm:$0xff] %v122_v5 }
  0x9d   :  { %137 = dma.vmem_to_hbm [thread:$0]  %s130_s4, 256, %s132_s7, [#allocation4], %s202_s8, %s202_s8, %s203_s9  }
  0x9e   :  { %196 = dma.done.wait [#allocation4], 256  }
  0x9f   :  { %197 = vsyncadd [#allocation4], 4294967040 }
  0xa0   :  { %142 = vsyncpa [#allocation4], 1 }
  0xa1   :  { %143 = vsyncpa [#allocation5], 1 }

</bundles_post_ra>
